<compile_context>
chip_gen: v5e
topology: v5e:2x2
jax: 0.10.0
libtpu: 0.0.40
codegen_flags: <defaults>
</compile_context>

<pallas_src>
import functools

import jax
import jax.numpy as jnp
from jax.experimental import pallas as pl
from jax.experimental.pallas import tpu as pltpu


_K_PAD = 8  # fc1 contraction dim zero-padded 4 -> 8 (sublane-friendly MXU operand)

# generation -> (tb_cap, vmem_limit_bytes, multi_tensorcore, bf16_activations)
_GEN_CFG = {
    "v5e": (8192, 64 << 20, False, False),  # 128 MiB VMEM, no bf16 VPU, 1 TC
    "v6e": (8192, 64 << 20, False, True),   # 128 MiB VMEM, bf16 VPU, 1 TC
    "v7x": (4096, 48 << 20, True,  True),   # 64 MiB VMEM/TC, bf16 VPU, 2 TCs
    "v5p": (8192, 64 << 20, True,  False),
    "v4":  (8192, 64 << 20, True,  False),
}
_DEFAULT_CFG = (4096, 32 << 20, False, False)  # conservative fallback


def _tpu_generation():
    try:
        kind = jax.devices()[0].device_kind.lower()
    except Exception:
        return "unknown"
    for tag, gen in (("v7", "v7x"), ("v6", "v6e"), ("v5p", "v5p"),
                     ("v5", "v5e"), ("v4", "v4")):
        if tag in kind:
            return gen
    return "unknown"


def _resident_spec(shape):
    # Constant index_map -> fetched once, stays VMEM-resident for the whole grid.
    # Buffered(1): no point double-buffering a block whose index never changes.
    try:
        return pl.BlockSpec(shape, lambda i: (0, 0), pipeline_mode=pl.Buffered(1))
    except (AttributeError, TypeError):
        return pl.BlockSpec(shape, lambda i: (0, 0))


def qnet_kernel(x_ref, w1_ref, b1_ref, w2_ref, b2_ref, w3_ref, b3_ref, o_ref,
                *, bf16_act):
    """One batch tile: x (8, TB) bf16 -> q-values (2, TB) f32."""
    x = x_ref[...]                                                    # (8, TB) bf16

    # fc1 on the MXU (K padded 4->8), f32 accumulation.
    h1 = jnp.dot(w1_ref[...], x, preferred_element_type=jnp.float32)  # (128, TB)
    if bf16_act:
        # v6e/v7x (bf16 VPU): bias/ReLU on packed bf16 vregs -> half the VALU
        # work and no separate f32->bf16 pack before the next MXU pass.
        h1 = jnp.maximum(h1.astype(jnp.bfloat16) + b1_ref[...], 0)
        h2 = jnp.dot(w2_ref[...], h1, preferred_element_type=jnp.float32)
        h2 = jnp.maximum(h2.astype(jnp.bfloat16) + b2_ref[...], 0)
        out = jnp.dot(w3_ref[...], h2, preferred_element_type=jnp.float32)  # (2, TB)
    else:
        # v5e (no bf16 VALU): bias/ReLU in f32, cast to bf16 only for the MXU.
        h1 = jnp.maximum(h1 + b1_ref[...], 0.0)
        h2 = jnp.dot(w2_ref[...], h1.astype(jnp.bfloat16),
                     preferred_element_type=jnp.float32)
        h2 = jnp.maximum(h2 + b2_ref[...], 0.0)
        out = jnp.dot(w3_ref[...], h2.astype(jnp.bfloat16),
                      preferred_element_type=jnp.float32)

    o_ref[...] = (out + b3_ref[...]).astype(o_ref.dtype)


def qnet_forward_fb(x_fb, params, *, tb=4096):
    """Qnet forward in the kernel-native layout.

    x_fb: (4, B) with the batch on the lane axis; returns (2, B) f32 q-values.
    Prefer this entry point end-to-end to avoid the (B,4)<->(4,B) transposes
    that dominate total latency at small DQN batch sizes.
    """
    assert tb % 128 == 0 and tb >= 128, "tb must be a positive multiple of 128"
    w1, b1, w2, b2, w3, b3 = params
    n_in, n_act = w1.shape[1], w3.shape[0]
    assert x_fb.shape[0] == n_in
    B = x_fb.shape[1]

    gen = _tpu_generation()
    tb_cap, vmem_limit, multi_tc, bf16_act = _GEN_CFG.get(gen, _DEFAULT_CFG)

    # Tile selection: biggest tile VMEM allows to amortize per-step overhead.
    # Single-TC chips -> one maximal tile; v7x -> keep >= 2 tiles so the
    # "parallel" batch axis is sharded across both TensorCores.
    n_tiles = pl.cdiv(B, 128)
    tb = min(tb, tb_cap)
    if multi_tc and n_tiles >= 2:
        tb = min(tb, ((n_tiles + 1) // 2) * 128)
    else:
        tb = min(tb, n_tiles * 128)
    grid_b = pl.cdiv(B, tb)
    B_pad = grid_b * tb

    # Operand prep: everything feeding the MXU goes bf16 (f32 accumulation in
    # the kernel); fc1's K dim is zero-padded 4->8; biases become (out, 1)
    # columns so they broadcast over the lane/batch axis.
    act_dt = jnp.bfloat16 if bf16_act else jnp.float32
    xk = jnp.pad(x_fb.astype(jnp.bfloat16), ((0, _K_PAD - n_in), (0, B_pad - B)))
    w1k = jnp.pad(w1.astype(jnp.bfloat16), ((0, 0), (0, _K_PAD - n_in)))
    w2k = w2.astype(jnp.bfloat16)
    w3k = w3.astype(jnp.bfloat16)
    b1k = b1.reshape(-1, 1).astype(act_dt)
    b2k = b2.reshape(-1, 1).astype(act_dt)
    b3k = b3.reshape(-1, 1).astype(jnp.float32)

    out = pl.pallas_call(
        functools.partial(qnet_kernel, bf16_act=bf16_act),
        out_shape=jax.ShapeDtypeStruct((n_act, B_pad), jnp.float32),
        grid=(grid_b,),
        in_specs=[
            pl.BlockSpec((_K_PAD, tb), lambda i: (0, i)),   # x tile, pipelined
            _resident_spec(w1k.shape), _resident_spec(b1k.shape),
            _resident_spec(w2k.shape), _resident_spec(b2k.shape),
            _resident_spec(w3k.shape), _resident_spec(b3k.shape),
        ],
        out_specs=pl.BlockSpec((n_act, tb), lambda i: (0, i)),
        compiler_params=pltpu.CompilerParams(
            dimension_semantics=("parallel",),
            vmem_limit_bytes=vmem_limit),
    )(xk, w1k, b1k, w2k, b2k, w3k, b3k)

    return out[:, :B]


def qnet_forward(x, params, *, tb=4096):
    """PyTorch-layout wrapper: x (B, 4) f32 -> (B, 2) f32 q-values."""
    return qnet_forward_fb(x.T, params, tb=tb).T


def qnet_reference_f32(x, params):
    """Pure-f32 reference with the original PyTorch semantics."""
    w1, b1, w2, b2, w3, b3 = params
    h = jnp.maximum(x @ w1.T + b1, 0.0)
    h = jnp.maximum(h @ w2.T + b2, 0.0)
    return h @ w3.T + b3


def qnet_reference_emulated(x, params, bf16_act):
    """JAX emulation of the exact kernel math (bf16 MXU operands, f32 accum)."""
    bf16 = jnp.bfloat16
    w1, b1, w2, b2, w3, b3 = params
    h1 = jnp.dot(x.astype(bf16), w1.astype(bf16).T,
                 preferred_element_type=jnp.float32)
    if bf16_act:
        h1 = jnp.maximum(h1.astype(bf16) + b1.astype(bf16), 0)
        h2 = jnp.dot(h1, w2.astype(bf16).T, preferred_element_type=jnp.float32)
        h2 = jnp.maximum(h2.astype(bf16) + b2.astype(bf16), 0)
        out = jnp.dot(h2, w3.astype(bf16).T, preferred_element_type=jnp.float32)
    else:
        h1 = jnp.maximum(h1 + b1, 0.0)
        h2 = jnp.dot(h1.astype(bf16), w2.astype(bf16).T,
                     preferred_element_type=jnp.float32)
        h2 = jnp.maximum(h2 + b2, 0.0)
        out = jnp.dot(h2.astype(bf16), w3.astype(bf16).T,
                      preferred_element_type=jnp.float32)
    return out + b3


def init_qnet_params(key):
    """PyTorch nn.Linear default init: U(+/- 1/sqrt(fan_in)); weight (out, in)."""
    dims = [(4, 128), (128, 128), (128, 2)]
    params = []
    for fan_in, fan_out in dims:
        kw, kb, key = jax.random.split(key, 3)
        bound = 1.0 / float(fan_in) ** 0.5
        w = jax.random.uniform(kw, (fan_out, fan_in), jnp.float32, -bound, bound)
        b = jax.random.uniform(kb, (fan_out,), jnp.float32, -bound, bound)
        params.extend([w, b])
    return tuple(params)


# TODO(synk): Qnet.sample_action (host-side epsilon-greedy using random.random)
# is control flow outside the forward pass and is not implemented as a kernel.

if __name__ == "__main__":
    key = jax.random.PRNGKey(0)
    kx, kp = jax.random.split(key)

    B = 200  # deliberately not a multiple of 128 -> exercises batch padding
    x = jax.random.normal(kx, (B, 4), dtype=jnp.float32)
    params = init_qnet_params(kp)

    bf16_act = _GEN_CFG.get(_tpu_generation(), _DEFAULT_CFG)[3]
    ref_f32 = qnet_reference_f32(x, params)
    ref_emu = qnet_reference_emulated(x, params, bf16_act)

    # (1) Auto-tuned tile: one maximal tile on v5e/v6e, two tiles on v7x.
    out = jax.block_until_ready(qnet_forward(x, params))
    assert out.shape == (B, 2)
    assert jnp.allclose(out, ref_emu, atol=2e-3, rtol=2e-3)   # kernel-matched
    assert jnp.allclose(out, ref_f32, atol=2e-2, rtol=2e-2)   # PyTorch f32 ref

    # (2) Forced small tile -> multi-step grid, exercises the pipelined path.
    out2 = jax.block_until_ready(qnet_forward(x, params, tb=128))
    assert out2.shape == (B, 2)
    assert jnp.allclose(out2, ref_emu, atol=2e-3, rtol=2e-3)

    print("KERNEL_OK")
</pallas_src>

<mosaic_0001>
module attributes {stable_mosaic.version = 11 : i64} {
  func.func @qnet_kernel(%arg0: i32, %arg1: memref<8x256xbf16, #tpu.memory_space<vmem>>, %arg2: memref<128x8xbf16, #tpu.memory_space<vmem>>, %arg3: memref<128x1xf32, #tpu.memory_space<vmem>>, %arg4: memref<128x128xbf16, #tpu.memory_space<vmem>>, %arg5: memref<128x1xf32, #tpu.memory_space<vmem>>, %arg6: memref<2x128xbf16, #tpu.memory_space<vmem>>, %arg7: memref<2x1xf32, #tpu.memory_space<vmem>>, %arg8: memref<2x256xf32, #tpu.memory_space<vmem>>) attributes {dimension_semantics = [#tpu.dimension_semantics<parallel>], iteration_bounds = array<i64: 1>, scalar_prefetch = 0 : i64, scratch_operands = 0 : i64, tpu.core_type = #tpu.core_type<tc>, window_params = [{transform_indices = @transform_0, window_bounds = array<i64: 8, 256>}, {pipeline_mode = #tpu.pipeline_mode<synchronous>, transform_indices = @transform_1, window_bounds = array<i64: 128, 8>}, {pipeline_mode = #tpu.pipeline_mode<synchronous>, transform_indices = @transform_2, window_bounds = array<i64: 128, 1>}, {pipeline_mode = #tpu.pipeline_mode<synchronous>, transform_indices = @transform_3, window_bounds = array<i64: 128, 128>}, {pipeline_mode = #tpu.pipeline_mode<synchronous>, transform_indices = @transform_4, window_bounds = array<i64: 128, 1>}, {pipeline_mode = #tpu.pipeline_mode<synchronous>, transform_indices = @transform_5, window_bounds = array<i64: 2, 128>}, {pipeline_mode = #tpu.pipeline_mode<synchronous>, transform_indices = @transform_6, window_bounds = array<i64: 2, 1>}, {transform_indices = @transform_7, window_bounds = array<i64: 2, 256>}]} {
    %c0 = arith.constant 0 : index
    %c0_0 = arith.constant 0 : index
    %0 = vector.load %arg1[%c0, %c0_0] : memref<8x256xbf16, #tpu.memory_space<vmem>>, vector<8x256xbf16>
    %c0_1 = arith.constant 0 : index
    %c0_2 = arith.constant 0 : index
    %1 = vector.load %arg2[%c0_1, %c0_2] : memref<128x8xbf16, #tpu.memory_space<vmem>>, vector<128x8xbf16>
    %cst = arith.constant dense<0.000000e+00> : vector<128x256xf32>
    %2 = tpu.matmul %1, %0, %cst {dimension_numbers = #tpu.dot_dimension_numbers<[1], [0], [0], [1], [0, 0, 1, 1], [], []>} : vector<128x8xbf16>, vector<8x256xbf16>, vector<128x256xf32> -> vector<128x256xf32>
    %c0_3 = arith.constant 0 : index
    %c0_4 = arith.constant 0 : index
    %3 = vector.load %arg3[%c0_3, %c0_4] : memref<128x1xf32, #tpu.memory_space<vmem>>, vector<128x1xf32>
    %4 = vector.broadcast %3 : vector<128x1xf32> to vector<128x256xf32>
    %5 = arith.addf %2, %4 : vector<128x256xf32>
    %cst_5 = arith.constant 0.000000e+00 : f32
    %6 = vector.broadcast %cst_5 : f32 to vector<128x256xf32>
    %7 = arith.maximumf %5, %6 : vector<128x256xf32>
    %c0_6 = arith.constant 0 : index
    %c0_7 = arith.constant 0 : index
    %8 = vector.load %arg4[%c0_6, %c0_7] : memref<128x128xbf16, #tpu.memory_space<vmem>>, vector<128x128xbf16>
    %9 = arith.truncf %7 : vector<128x256xf32> to vector<128x256xbf16>
    %cst_8 = arith.constant dense<0.000000e+00> : vector<128x256xf32>
    %10 = tpu.matmul %8, %9, %cst_8 {dimension_numbers = #tpu.dot_dimension_numbers<[1], [0], [0], [1], [0, 0, 1, 1], [], []>} : vector<128x128xbf16>, vector<128x256xbf16>, vector<128x256xf32> -> vector<128x256xf32>
    %c0_9 = arith.constant 0 : index
    %c0_10 = arith.constant 0 : index
    %11 = vector.load %arg5[%c0_9, %c0_10] : memref<128x1xf32, #tpu.memory_space<vmem>>, vector<128x1xf32>
    %12 = vector.broadcast %11 : vector<128x1xf32> to vector<128x256xf32>
    %13 = arith.addf %10, %12 : vector<128x256xf32>
    %cst_11 = arith.constant 0.000000e+00 : f32
    %14 = vector.broadcast %cst_11 : f32 to vector<128x256xf32>
    %15 = arith.maximumf %13, %14 : vector<128x256xf32>
    %c0_12 = arith.constant 0 : index
    %c0_13 = arith.constant 0 : index
    %16 = vector.load %arg6[%c0_12, %c0_13] : memref<2x128xbf16, #tpu.memory_space<vmem>>, vector<2x128xbf16>
    %17 = arith.truncf %15 : vector<128x256xf32> to vector<128x256xbf16>
    %cst_14 = arith.constant dense<0.000000e+00> : vector<2x256xf32>
    %18 = tpu.matmul %16, %17, %cst_14 {dimension_numbers = #tpu.dot_dimension_numbers<[1], [0], [0], [1], [0, 0, 1, 1], [], []>} : vector<2x128xbf16>, vector<128x256xbf16>, vector<2x256xf32> -> vector<2x256xf32>
    %c0_15 = arith.constant 0 : index
    %c0_16 = arith.constant 0 : index
    %19 = vector.load %arg7[%c0_15, %c0_16] : memref<2x1xf32, #tpu.memory_space<vmem>>, vector<2x1xf32>
    %20 = vector.broadcast %19 : vector<2x1xf32> to vector<2x256xf32>
    %21 = arith.addf %18, %20 : vector<2x256xf32>
    %c0_17 = arith.constant 0 : index
    %c0_18 = arith.constant 0 : index
    %22 = vector.load %arg8[%c0_17, %c0_18] : memref<2x256xf32, #tpu.memory_space<vmem>>, vector<2x256xf32>
    tpu.vector_store %arg8[%c0_17, %c0_18], %21 {strides = array<i32>} : memref<2x256xf32, #tpu.memory_space<vmem>>, vector<2x256xf32>,
    return
  }
  func.func @transform_0(%arg0: i32) -> (i32, i32) {
    %c0_i32 = arith.constant 0 : i32
    %c0_i32_0 = arith.constant 0 : i32
    return %c0_i32, %arg0 : i32, i32
  }
  func.func @transform_1(%arg0: i32) -> (i32, i32) {
    %c0_i32 = arith.constant 0 : i32
    %c0_i32_0 = arith.constant 0 : i32
    %c0_i32_1 = arith.constant 0 : i32
    return %c0_i32, %c0_i32_0 : i32, i32
  }
  func.func @transform_2(%arg0: i32) -> (i32, i32) {
    %c0_i32 = arith.constant 0 : i32
    %c0_i32_0 = arith.constant 0 : i32
    %c0_i32_1 = arith.constant 0 : i32
    return %c0_i32, %c0_i32_0 : i32, i32
  }
  func.func @transform_3(%arg0: i32) -> (i32, i32) {
    %c0_i32 = arith.constant 0 : i32
    %c0_i32_0 = arith.constant 0 : i32
    %c0_i32_1 = arith.constant 0 : i32
    return %c0_i32, %c0_i32_0 : i32, i32
  }
  func.func @transform_4(%arg0: i32) -> (i32, i32) {
    %c0_i32 = arith.constant 0 : i32
    %c0_i32_0 = arith.constant 0 : i32
    %c0_i32_1 = arith.constant 0 : i32
    return %c0_i32, %c0_i32_0 : i32, i32
  }
  func.func @transform_5(%arg0: i32) -> (i32, i32) {
    %c0_i32 = arith.constant 0 : i32
    %c0_i32_0 = arith.constant 0 : i32
    %c0_i32_1 = arith.constant 0 : i32
    return %c0_i32, %c0_i32_0 : i32, i32
  }
  func.func @transform_6(%arg0: i32) -> (i32, i32) {
    %c0_i32 = arith.constant 0 : i32
    %c0_i32_0 = arith.constant 0 : i32
    %c0_i32_1 = arith.constant 0 : i32
    return %c0_i32, %c0_i32_0 : i32, i32
  }
  func.func @transform_7(%arg0: i32) -> (i32, i32) {
    %c0_i32 = arith.constant 0 : i32
    %c0_i32_0 = arith.constant 0 : i32
    return %c0_i32, %arg0 : i32, i32
  }
}

</mosaic_0001>

<bundles_post_ra>
// kernel: tpu_custom_call.1
= control target key start
LH: loop header
LB: loop body
LE: loop exit
PB: predicated region body
PF: predicated region fallthrough
CT: control target
= control target key end

     0   :  { %v853_v2 = vmov 0   ;;  %vm211_vm0 = vcmask 1043456   ;;  %s1179_s0 = inlined_call_operand.vmem [shape: bf16[8,256], index: 0, kind: input, shape index: {}]   ;;  %s1180_s1 = inlined_call_operand.vmem [shape: bf16[128,8], index: 1, kind: input, shape index: {}]   ;;  %s1181_s2 = inlined_call_operand.vmem [shape: f32[128,1], index: 2, kind: input, shape index: {}]   ;;  %s1182_s3 = inlined_call_operand.vmem [shape: bf16[128,128], index: 3, kind: input, shape index: {}]   ;;  %s1183_s4 = inlined_call_operand.vmem [shape: f32[128,1], index: 4, kind: input, shape index: {}]   ;;  %s1184_s5 = inlined_call_operand.vmem [shape: bf16[2,128], index: 5, kind: input, shape index: {}]   ;;  %s1185_s6 = inlined_call_operand.vmem [shape: f32[2,1], index: 6, kind: input, shape index: {}]   ;;  %s1186_s7 = inlined_call_operand.hbm [shape: f32[2,256], index: 7, kind: output, shape index: {}]  }
   0x1   :  { %v59_v0 = vld [vmem:[%s1181_s2 + $0x70] sm:$0xff]  ;;  %v28_v1 = vld [vmem:[%s1179_s0] sm:$0xff]  ;;  %824 = vset.pattern.permute.xlu0 %v853_v2  ;;  %826 = vset.pattern.permute.xlu2 %v853_v2 }
   0x2   :  { %v182_v3 = vunpack.c.l.b16 %v28_v1  ;;  %v183_v4 = vunpack.c.h.b16 %v28_v1  ;;  %v57_v5 = vld [vmem:[%s1181_s2 + $0x60] sm:$0xff]  ;;  %v55_v6 = vld [vmem:[%s1181_s2 + $0x50] sm:$0xff]  ;;  %133 = vperm.xlu0 %824, %v59_v0   ;;  %825 = vset.pattern.permute.xlu1 %v853_v2 }
   0x3   :  { %123 = vperm.xlu1 %825, %v57_v5   ;;  %113 = vperm.xlu2 %826, %v55_v6   ;;  %v806_v11 = vld [vmem:[%s1180_s1] sm:$0xff] }
   0x4   :  { %v184_v7 = vpack.c.b16 %v182_v3, %v182_v3  ;;  %v185_v8 = vpack.c.b16 %v183_v4, %v183_v4 }
   0x6   :  { %v213_v9 = vsel %vm211_vm0, %v184_v7, 0  ;;  %v216_v10 = vsel %vm211_vm0, %v185_v8, 0 }
   0x7   :  { %12 = vsyncpa [#allocation3], 0  ;;  %225 = vmatpush.bf16.msra.mxu0 %v213_v9  ;;  %274 = vmatpush.bf16.msra.mxu1 %v216_v10  ;;  %vm186_vm1 = vcmask 64512   ;;  %v60_v12 = vld [vmem:[%s1181_s2 + $0x78] sm:$0xff]  ;;  %v58_v13 = vld [vmem:[%s1181_s2 + $0x68] sm:$0xff]  ;;  %s854_s23 = smov [#allocation2]  }
   0x8   :  { %v56_v14 = vld [vmem:[%s1181_s2 + $0x58] sm:$0xff]  ;;  %v53_v15 = vld [vmem:[%s1181_s2 + $0x40] sm:$0xff]  ;;  %v54_v16 = vld [vmem:[%s1181_s2 + $0x48] sm:$0xff]  ;;  %s715_s24 = sshll.u32 %s854_s23, 4  ;;  %s717_s27 = sshll.u32 %s1186_s7, 4  ;;  %vm706_vm2 = vcmask 1041408   ;;  %s716_s24 = int_to_ptr.vmem [resolvable:$true] %s715_s24  ;;  %s718_s27 = int_to_ptr.hbm [resolvable:$true] %s717_s27 }
   0x9   :  { %v51_v17 = vld [vmem:[%s1181_s2 + $0x30] sm:$0xff]  ;;  %v807_v18 = vld [vmem:[%s1180_s1 + $0x8] sm:$0xff]  ;;  %v52_v19 = vld [vmem:[%s1181_s2 + $0x38] sm:$0xff] }
   0xa   :  { %758 = vmatmul.msk.bf16.vlgmr.msra.gmra.mxu0 %vm186_vm1, %v806_v11  ;;  %766 = vmatmul.msk.bf16.vlgmr.msra.gmra.mxu1 %vm186_vm1, %v806_v11  ;;  %v50_v20 = vld [vmem:[%s1181_s2 + $0x28] sm:$0xff]  ;;  %v49_v21 = vld [vmem:[%s1181_s2 + $0x20] sm:$0xff]  ;;  %v47_v22 = vld [vmem:[%s1181_s2 + $0x10] sm:$0xff] }
   0xb   :  { %138 = vperm.xlu0 %824, %v60_v12   ;;  %128 = vperm.xlu1 %825, %v58_v13   ;;  %v48_v23 = vld [vmem:[%s1181_s2 + $0x18] sm:$0xff]  ;;  %v45_v24 = vld [vmem:[%s1181_s2] sm:$0xff]  ;;  %v808_v25 = vld [vmem:[%s1180_s1 + $0x10] sm:$0xff] }
   0xc   :  { %118 = vperm.xlu2 %826, %v56_v14   ;;  %v46_v26 = vld [vmem:[%s1181_s2 + $0x8] sm:$0xff]  ;;  %v809_v27 = vld [vmem:[%s1180_s1 + $0x18] sm:$0xff]  ;;  %v394_v28 = vld [vmem:[%s1183_s4 + $0x70] sm:$0xff] }
   0xd   :  { %v392_v29 = vld [vmem:[%s1183_s4 + $0x60] sm:$0xff]  ;;  %v393_v30 = vld [vmem:[%s1183_s4 + $0x68] sm:$0xff]  ;;  %v391_v31 = vld [vmem:[%s1183_s4 + $0x58] sm:$0xff] }
   0xe   :  { %v810_v32 = vld [vmem:[%s1180_s1 + $0x20] sm:$0xff]  ;;  %v386_v34 = vld [vmem:[%s1183_s4 + $0x30] sm:$0xff]  ;;  %v387_v35 = vld [vmem:[%s1183_s4 + $0x38] sm:$0xff] }
   0xf   :  { %v388_v33 = vld [vmem:[%s1183_s4 + $0x40] sm:$0xff]  ;;  %v385_v36 = vld [vmem:[%s1183_s4 + $0x28] sm:$0xff]  ;;  %v395_v37 = vld [vmem:[%s1183_s4 + $0x78] sm:$0xff] }
  0x10   :  { %v811_v38 = vld [vmem:[%s1180_s1 + $0x28] sm:$0xff]  ;;  %v382_v39 = vld [vmem:[%s1183_s4 + $0x10] sm:$0xff]  ;;  %v380_v40 = vld [vmem:[%s1183_s4] sm:$0xff] }
  0x11   :  { %v390_v41 = vld [vmem:[%s1183_s4 + $0x50] sm:$0xff]  ;;  %v381_v42 = vld [vmem:[%s1183_s4 + $0x8] sm:$0xff]  ;;  %v384_v45 = vld [vmem:[%s1183_s4 + $0x20] sm:$0xff] }
  0x12   :  { %v812_v43 = vld [vmem:[%s1180_s1 + $0x30] sm:$0xff]  ;;  %v389_v44 = vld [vmem:[%s1183_s4 + $0x48] sm:$0xff]  ;;  %v813_v48 = vld [vmem:[%s1180_s1 + $0x38] sm:$0xff] }
  0x13   :  { %103 = vperm.xlu0 %824, %v53_v15   ;;  %108 = vperm.xlu1 %825, %v54_v16   ;;  %v383_v50 = vld [vmem:[%s1183_s4 + $0x18] sm:$0xff]  ;;  %v671_v54 = vld [vmem:[%s1185_s6] sm:$0x3] }
  0x14   :  { %93 = vperm.xlu2 %826, %v51_v17  }
  0x1a   :  { %759 = vmatmul.msk.bf16.gmra.mxu0 %vm186_vm1, %v807_v18  ;;  %767 = vmatmul.msk.bf16.gmra.mxu1 %vm186_vm1, %v807_v18 }
  0x1b   :  { %98 = vperm.xlu0 %824, %v52_v19   ;;  %83 = vperm.xlu1 %825, %v49_v21  }
  0x1c   :  { %88 = vperm.xlu2 %826, %v50_v20  }
  0x23   :  { %73 = vperm.xlu0 %824, %v47_v22   ;;  %78 = vperm.xlu1 %825, %v48_v23  }
  0x24   :  { %63 = vperm.xlu2 %826, %v45_v24  }
  0x2a   :  { %760 = vmatmul.msk.bf16.gmra.mxu0 %vm186_vm1, %v808_v25  ;;  %768 = vmatmul.msk.bf16.gmra.mxu1 %vm186_vm1, %v808_v25 }
  0x2b   :  { %68 = vperm.xlu0 %824, %v46_v26   ;;  %468 = vperm.xlu1 %825, %v394_v28  }
  0x2c   :  { %473 = vperm.xlu2 %826, %v395_v37  }
  0x33   :  { %458 = vperm.xlu0 %824, %v392_v29   ;;  %463 = vperm.xlu1 %825, %v393_v30  }
  0x34   :  { %448 = vperm.xlu2 %826, %v390_v41  }
  0x3a   :  { %761 = vmatmul.msk.bf16.gmra.mxu0 %vm186_vm1, %v809_v27  ;;  %769 = vmatmul.msk.bf16.gmra.mxu1 %vm186_vm1, %v809_v27 }
  0x3b   :  { %453 = vperm.xlu0 %824, %v391_v31   ;;  %438 = vperm.xlu1 %825, %v388_v33  }
  0x3c   :  { %443 = vperm.xlu2 %826, %v389_v44  }
  0x43   :  { %428 = vperm.xlu0 %824, %v386_v34   ;;  %433 = vperm.xlu1 %825, %v387_v35  }
  0x44   :  { %418 = vperm.xlu2 %826, %v384_v45  }
  0x4a   :  { %762 = vmatmul.msk.bf16.gmra.mxu0 %vm186_vm1, %v810_v32  ;;  %770 = vmatmul.msk.bf16.gmra.mxu1 %vm186_vm1, %v810_v32 }
  0x4b   :  { %423 = vperm.xlu0 %824, %v385_v36   ;;  %408 = vperm.xlu1 %825, %v382_v39  }
  0x4c   :  { %413 = vperm.xlu2 %826, %v383_v50  }
  0x53   :  { %398 = vperm.xlu0 %824, %v380_v40   ;;  %403 = vperm.xlu1 %825, %v381_v42  }
  0x54   :  { %674 = vperm.xlu2 %826, %v671_v54  }
  0x5a   :  { %763 = vmatmul.msk.bf16.gmra.mxu0 %vm186_vm1, %v811_v38  ;;  %771 = vmatmul.msk.bf16.gmra.mxu1 %vm186_vm1, %v811_v38 }
  0x5d   :  { %v1026_v46 = vpop.permute.xlu2 %113 }
  0x66   :  { %v1038_v51 = vpop.permute.xlu2 %118 }
  0x6a   :  { %764 = vmatmul.msk.bf16.gmra.mxu0 %vm186_vm1, %v812_v43  ;;  %772 = vmatmul.msk.bf16.gmra.mxu1 %vm186_vm1, %v812_v43 }
  0x6e   :  { %v94_v55 = vpop.permute.xlu2 %93 }
  0x74   :  { %v1028_v47 = vpop.permute.xlu0 %133 }
  0x75   :  { %v1033_v49 = vpop.permute.xlu1 %123 }
  0x76   :  { %v89_v61 = vpop.permute.xlu2 %88 }
  0x7a   :  { %765 = vmatmul.msk.bf16.gmra.mxu0 %vm186_vm1, %v813_v48  ;;  %773 = vmatmul.msk.bf16.gmra.mxu1 %vm186_vm1, %v813_v48 }
  0x7d   :  { %v1042_v52 = vpop.permute.xlu0 %138  ;;  %v1044_v53 = vpop.permute.xlu1 %128 }
  0x7e   :  { %v64_v4 = vpop.permute.xlu2 %63 }
  0x85   :  { %v1049_v56 = vpop.permute.xlu0 %103  ;;  %v1051_v59 = vpop.permute.xlu1 %108 }
  0x87   :  { %v227_v57 = vpop.f32.mrf.mxu0  ;;  %v276_v58 = vpop.f32.mrf.mxu1 }
  0x88   :  { %v228_v5 = vadd.f32 %v227_v57, %v64_v4  ;;  %v277_v6 = vadd.f32 %v276_v58, %v64_v4 }
  0x8a   :  { %v316_v13 = vmax.f32 %v228_v5, 0.0  ;;  %v317_v14 = vmax.f32 %v277_v6, 0.0 }
  0x8d   :  { %v99_v60 = vpop.permute.xlu0 %98  ;;  %v84_v0 = vpop.permute.xlu1 %83 }
  0x8f   :  { %v229_v62 = vpop.f32.mrf.mxu0  ;;  %v278_v63 = vpop.f32.mrf.mxu1 }
  0x95   :  { %v74_v1 = vpop.permute.xlu0 %73  ;;  %v79_v10 = vpop.permute.xlu1 %78 }
  0x97   :  { %v232_v2 = vpop.f32.mrf.mxu0  ;;  %v281_v3 = vpop.f32.mrf.mxu1 }
  0x98   :  { %v233_v7 = vadd.f32 %v232_v2, %v74_v1  ;;  %v282_v8 = vadd.f32 %v281_v3, %v74_v1 }
  0x9a   :  { %v320_v21 = vmax.f32 %v233_v7, 0.0  ;;  %v321_v22 = vmax.f32 %v282_v8, 0.0 }
  0x9d   :  { %v69_v9 = vpop.permute.xlu0 %68 }
  0x9e   :  { %v230_v11 = vadd.f32 %v229_v62, %v69_v9  ;;  %v279_v12 = vadd.f32 %v278_v63, %v69_v9 }
  0x9f   :  { %v234_v15 = vpop.f32.mrf.mxu0  ;;  %v283_v16 = vpop.f32.mrf.mxu1 }
  0xa0   :  { %v318_v17 = vmax.f32 %v230_v11, 0.0  ;;  %v319_v18 = vmax.f32 %v279_v12, 0.0  ;;  %v235_v19 = vadd.f32 %v234_v15, %v79_v10  ;;  %v284_v20 = vadd.f32 %v283_v16, %v79_v10 }
  0xa2   :  { %v322_v23 = vmax.f32 %v235_v19, 0.0  ;;  %v323_v24 = vmax.f32 %v284_v20, 0.0  ;;  %v1053_v25 = vpack.c.bf16 %v318_v17, %v316_v13  ;;  %v1055_v26 = vpack.c.bf16 %v319_v18, %v317_v14 }
  0xa4   :  { %v1057_v27 = vpack.c.bf16 %v322_v23, %v320_v21  ;;  %v1059_v28 = vpack.c.bf16 %v323_v24, %v321_v22 }
  0xa7   :  { %v237_v29 = vpop.f32.mrf.mxu0  ;;  %v286_v30 = vpop.f32.mrf.mxu1 }
  0xa8   :  { %v238_v31 = vadd.f32 %v237_v29, %v84_v0  ;;  %v287_v32 = vadd.f32 %v286_v30, %v84_v0 }
  0xaa   :  { %v324_v37 = vmax.f32 %v238_v31, 0.0  ;;  %v325_v38 = vmax.f32 %v287_v32, 0.0 }
  0xaf   :  { %v239_v33 = vpop.f32.mrf.mxu0  ;;  %v288_v34 = vpop.f32.mrf.mxu1 }
  0xb0   :  { %v240_v35 = vadd.f32 %v239_v33, %v89_v61  ;;  %v289_v36 = vadd.f32 %v288_v34, %v89_v61 }
  0xb2   :  { %v326_v39 = vmax.f32 %v240_v35, 0.0  ;;  %v327_v40 = vmax.f32 %v289_v36, 0.0 }
  0xb4   :  { %v1061_v41 = vpack.c.bf16 %v326_v39, %v324_v37  ;;  %v1063_v42 = vpack.c.bf16 %v327_v40, %v325_v38 }
  0xb7   :  { %v242_v43 = vpop.f32.mrf.mxu0  ;;  %v291_v44 = vpop.f32.mrf.mxu1 }
  0xb8   :  { %v243_v45 = vadd.f32 %v242_v43, %v94_v55  ;;  %v292_v48 = vadd.f32 %v291_v44, %v94_v55 }
  0xba   :  { %v328_v62 = vmax.f32 %v243_v45, 0.0  ;;  %v329_v63 = vmax.f32 %v292_v48, 0.0 }
  0xbf   :  { %v244_v50 = vpop.f32.mrf.mxu0  ;;  %v293_v54 = vpop.f32.mrf.mxu1 }
  0xc0   :  { %v245_v57 = vadd.f32 %v244_v50, %v99_v60  ;;  %v294_v58 = vadd.f32 %v293_v54, %v99_v60 }
  0xc2   :  { %v330_v0 = vmax.f32 %v245_v57, 0.0  ;;  %v331_v61 = vmax.f32 %v294_v58, 0.0 }
  0xc4   :  { %v1065_v1 = vpack.c.bf16 %v330_v0, %v328_v62  ;;  %v1067_v2 = vpack.c.bf16 %v331_v61, %v329_v63 }
  0xc7   :  { %v247_v3 = vpop.f32.mrf.mxu0  ;;  %v296_v4 = vpop.f32.mrf.mxu1 }
  0xc8   :  { %v248_v48 = vadd.f32 %v247_v3, %v1049_v56  ;;  %v297_v50 = vadd.f32 %v296_v4, %v1049_v56  ;;  %v814_v56 = vld [vmem:[%s1182_s3] sm:$0xff] }
  0xca   :  { %v332_v0 = vmax.f32 %v248_v48, 0.0  ;;  %v333_v61 = vmax.f32 %v297_v50, 0.0 }
  0xcf   :  { %v249_v5 = vpop.f32.mrf.mxu0  ;;  %v298_v6 = vpop.f32.mrf.mxu1 }
  0xd0   :  { %v299_v40 = vadd.f32 %v298_v6, %v1051_v59 }
  0xd2   :  { %v335_v58 = vmax.f32 %v299_v40, 0.0 }
  0xd7   :  { %v252_v7 = vpop.f32.mrf.mxu0  ;;  %v301_v8 = vpop.f32.mrf.mxu1 }
  0xd8   :  { %v253_v37 = vadd.f32 %v252_v7, %v1026_v46  ;;  %v821_v7 = vld [vmem:[%s1182_s3 + $0x38] sm:$0xff] }
  0xda   :  { %v336_v54 = vmax.f32 %v253_v37, 0.0 }
  0xdf   :  { %v254_v9 = vpop.f32.mrf.mxu0  ;;  %v303_v55 = vpop.f32.mrf.mxu1 }
  0xe0   :  { %v304_v33 = vadd.f32 %v303_v55, %v1038_v51 }
  0xe2   :  { %v339_v44 = vmax.f32 %v304_v33, 0.0 }
  0xe7   :  { %v257_v10 = vpop.f32.mrf.mxu0  ;;  %v306_v11 = vpop.f32.mrf.mxu1 }
  0xe8   :  { %v258_v23 = vadd.f32 %v257_v10, %v1033_v49  ;;  %v307_v24 = vadd.f32 %v306_v11, %v1033_v49  ;;  %v250_v49 = vadd.f32 %v249_v5, %v1051_v59  ;;  %v373_v5 = vpack.c.bf16 %v335_v58, %v333_v61 }
  0xea   :  { %v340_v38 = vmax.f32 %v258_v23, 0.0  ;;  %v341_v39 = vmax.f32 %v307_v24, 0.0 }
  0xef   :  { %v259_v12 = vpop.f32.mrf.mxu0  ;;  %v308_v60 = vpop.f32.mrf.mxu1 }
  0xf0   :  { %v260_v19 = vadd.f32 %v259_v12, %v1044_v53  ;;  %v309_v20 = vadd.f32 %v308_v60, %v1044_v53 }
  0xf2   :  { %v342_v34 = vmax.f32 %v260_v19, 0.0  ;;  %v343_v35 = vmax.f32 %v309_v20, 0.0 }
  0xf4   :  { %v376_v45 = vpack.c.bf16 %v342_v34, %v340_v38 }
  0xf7   :  { %v262_v13 = vpop.f32.mrf.mxu0  ;;  %v311_v14 = vpop.f32.mrf.mxu1 }
  0xf8   :  { %v263_v15 = vadd.f32 %v262_v13, %v1028_v47  ;;  %v312_v16 = vadd.f32 %v311_v14, %v1028_v47  ;;  %v255_v47 = vadd.f32 %v254_v9, %v1038_v51  ;;  %v377_v51 = vpack.c.bf16 %v343_v35, %v341_v39 }
  0xfa   :  { %v344_v29 = vmax.f32 %v263_v15, 0.0  ;;  %v345_v30 = vmax.f32 %v312_v16, 0.0  ;;  %v338_v43 = vmax.f32 %v255_v47, 0.0 }
  0xfc   :  { %v374_v62 = vpack.c.bf16 %v338_v43, %v336_v54 }
  0xff   :  { %v264_v17 = vpop.f32.mrf.mxu0  ;;  %v313_v18 = vpop.f32.mrf.mxu1 }
 0x100   :  { %v265_v21 = vadd.f32 %v264_v17, %v1042_v52  ;;  %v314_v22 = vadd.f32 %v313_v18, %v1042_v52  ;;  %v302_v52 = vadd.f32 %v301_v8, %v1026_v46  ;;  %v334_v46 = vmax.f32 %v250_v49, 0.0  ;;  %v1127_v8 = vpop.permute.xlu2 %473 }
 0x102   :  { %v346_v31 = vmax.f32 %v265_v21, 0.0  ;;  %v347_v32 = vmax.f32 %v314_v22, 0.0  ;;  %v337_v57 = vmax.f32 %v302_v52, 0.0  ;;  %v372_v59 = vpack.c.bf16 %v334_v46, %v332_v0 }
 0x104   :  { %v378_v36 = vpack.c.bf16 %v346_v31, %v344_v29  ;;  %v379_v53 = vpack.c.bf16 %v347_v32, %v345_v30  ;;  %v375_v63 = vpack.c.bf16 %v339_v44, %v337_v57 }
 0x106   :  { %524 = vmatpush.bf16.msra.mxu2 %v378_v36  ;;  %573 = vmatpush.bf16.msra.mxu3 %v379_v53 }
 0x108   :  { %v1129_v10 = vpop.permute.xlu2 %448 }
 0x10a   :  { %525 = vmatpush.bf16.msra.mxu2 %v376_v45  ;;  %574 = vmatpush.bf16.msra.mxu3 %v377_v51 }
 0x10e   :  { %526 = vmatpush.bf16.msra.mxu2 %v374_v62  ;;  %575 = vmatpush.bf16.msra.mxu3 %v375_v63 }
 0x110   :  { %v1131_v14 = vpop.permute.xlu2 %443 }
 0x112   :  { %527 = vmatpush.bf16.msra.mxu2 %v372_v59  ;;  %576 = vmatpush.bf16.msra.mxu3 %v373_v5 }
 0x116   :  { %528 = vmatpush.bf16.msra.mxu2 %v1065_v1  ;;  %577 = vmatpush.bf16.msra.mxu3 %v1067_v2  ;;  %v820_v1 = vld [vmem:[%s1182_s3 + $0x30] sm:$0xff]  ;;  %v1116_v2 = vpop.permute.xlu0 %458 }
 0x118   :  { %v419_v31 = vpop.permute.xlu2 %418 }
 0x11a   :  { %529 = vmatpush.bf16.msra.mxu2 %v1061_v41  ;;  %578 = vmatpush.bf16.msra.mxu3 %v1063_v42  ;;  %v815_v41 = vld [vmem:[%s1182_s3 + $0x8] sm:$0xff]  ;;  %v1111_v42 = vpop.permute.xlu1 %468 }
 0x11e   :  { %530 = vmatpush.bf16.msra.mxu2 %v1057_v27  ;;  %579 = vmatpush.bf16.msra.mxu3 %v1059_v28  ;;  %v816_v27 = vld [vmem:[%s1182_s3 + $0x10] sm:$0xff]  ;;  %v819_v28 = vld [vmem:[%s1182_s3 + $0x28] sm:$0xff]  ;;  %v1120_v4 = vpop.permute.xlu0 %453 }
 0x120   :  { %v414_v35 = vpop.permute.xlu2 %413 }
 0x122   :  { %531 = vmatpush.bf16.msra.mxu2 %v1053_v25  ;;  %580 = vmatpush.bf16.msra.mxu3 %v1055_v26  ;;  %v817_v25 = vld [vmem:[%s1182_s3 + $0x18] sm:$0xff]  ;;  %v818_v26 = vld [vmem:[%s1182_s3 + $0x20] sm:$0xff]  ;;  %v1118_v3 = vpop.permute.xlu1 %463 }
 0x125   :  { %532 = vmatmul.bf16.vlgmr.msra.gmra.mxu2 %v814_v56  ;;  %581 = vmatmul.bf16.vlgmr.msra.gmra.mxu3 %v814_v56 }
 0x126   :  { %v429_v9 = vpop.permute.xlu0 %428 }
 0x12a   :  { %v1122_v6 = vpop.permute.xlu1 %438 }
 0x12e   :  { %v424_v11 = vpop.permute.xlu0 %423 }
 0x132   :  { %v434_v55 = vpop.permute.xlu1 %433 }
 0x135   :  { %537 = vmatmul.bf16.gmra.mxu2 %v815_v41  ;;  %586 = vmatmul.bf16.gmra.mxu3 %v815_v41 }
 0x136   :  { %v399_v15 = vpop.permute.xlu0 %398 }
 0x13a   :  { %v409_v12 = vpop.permute.xlu1 %408 }
 0x142   :  { %v404_v16 = vpop.permute.xlu1 %403 }
 0x145   :  { %542 = vmatmul.bf16.gmra.mxu2 %v816_v27  ;;  %591 = vmatmul.bf16.gmra.mxu3 %v816_v27 }
 0x155   :  { %547 = vmatmul.bf16.gmra.mxu2 %v817_v25  ;;  %596 = vmatmul.bf16.gmra.mxu3 %v817_v25 }
 0x165   :  { %552 = vmatmul.bf16.gmra.mxu2 %v818_v26  ;;  %601 = vmatmul.bf16.gmra.mxu3 %v818_v26 }
 0x175   :  { %557 = vmatmul.bf16.gmra.mxu2 %v819_v28  ;;  %606 = vmatmul.bf16.gmra.mxu3 %v819_v28 }
 0x185   :  { %562 = vmatmul.bf16.gmra.mxu2 %v820_v1  ;;  %611 = vmatmul.bf16.gmra.mxu3 %v820_v1 }
 0x195   :  { %567 = vmatmul.bf16.gmra.mxu2 %v821_v7  ;;  %616 = vmatmul.bf16.gmra.mxu3 %v821_v7 }
 0x1a8   :  { %v533_v60 = vpop.f32.mrf.mxu2  ;;  %v582_v13 = vpop.f32.mrf.mxu3 }
 0x1a9   :  { %v534_v17 = vadd.f32 %v533_v60, %v399_v15  ;;  %v583_v18 = vadd.f32 %v582_v13, %v399_v15 }
 0x1ab   :  { %v622_v23 = vmax.f32 %v534_v17, 0.0  ;;  %v623_v24 = vmax.f32 %v583_v18, 0.0 }
 0x1b0   :  { %v535_v19 = vpop.f32.mrf.mxu2  ;;  %v584_v20 = vpop.f32.mrf.mxu3 }
 0x1b1   :  { %v536_v21 = vadd.f32 %v535_v19, %v404_v16  ;;  %v585_v22 = vadd.f32 %v584_v20, %v404_v16 }
 0x1b3   :  { %v624_v29 = vmax.f32 %v536_v21, 0.0  ;;  %v625_v30 = vmax.f32 %v585_v22, 0.0 }
 0x1b5   :  { %v1133_v32 = vpack.c.bf16 %v624_v29, %v622_v23  ;;  %v1135_v47 = vpack.c.bf16 %v625_v30, %v623_v24 }
 0x1b8   :  { %v538_v33 = vpop.f32.mrf.mxu2  ;;  %v587_v34 = vpop.f32.mrf.mxu3 }
 0x1b9   :  { %v539_v36 = vadd.f32 %v538_v33, %v409_v12  ;;  %v588_v53 = vadd.f32 %v587_v34, %v409_v12 }
 0x1bb   :  { %v626_v49 = vmax.f32 %v539_v36, 0.0  ;;  %v627_v40 = vmax.f32 %v588_v53, 0.0 }
 0x1c0   :  { %v540_v37 = vpop.f32.mrf.mxu2  ;;  %v589_v52 = vpop.f32.mrf.mxu3 }
 0x1c1   :  { %v541_v38 = vadd.f32 %v540_v37, %v414_v35  ;;  %v590_v39 = vadd.f32 %v589_v52, %v414_v35 }
 0x1c3   :  { %v628_v43 = vmax.f32 %v541_v38, 0.0  ;;  %v629_v44 = vmax.f32 %v590_v39, 0.0 }
 0x1c5   :  { %v1137_v45 = vpack.c.bf16 %v628_v43, %v626_v49  ;;  %v1139_v51 = vpack.c.bf16 %v629_v44, %v627_v40 }
 0x1c8   :  { %v543_v48 = vpop.f32.mrf.mxu2  ;;  %v592_v50 = vpop.f32.mrf.mxu3 }
 0x1c9   :  { %v544_v54 = vadd.f32 %v543_v48, %v419_v31  ;;  %v593_v57 = vadd.f32 %v592_v50, %v419_v31 }
 0x1cb   :  { %v630_v0 = vmax.f32 %v544_v54, 0.0  ;;  %v631_v61 = vmax.f32 %v593_v57, 0.0 }
 0x1d0   :  { %v545_v46 = vpop.f32.mrf.mxu2  ;;  %v594_v58 = vpop.f32.mrf.mxu3 }
 0x1d1   :  { %v546_v62 = vadd.f32 %v545_v46, %v424_v11  ;;  %v595_v63 = vadd.f32 %v594_v58, %v424_v11 }
 0x1d3   :  { %v632_v59 = vmax.f32 %v546_v62, 0.0  ;;  %v633_v5 = vmax.f32 %v595_v63, 0.0 }
 0x1d5   :  { %v1141_v56 = vpack.c.bf16 %v632_v59, %v630_v0  ;;  %v1143_v41 = vpack.c.bf16 %v633_v5, %v631_v61 }
 0x1d8   :  { %v548_v27 = vpop.f32.mrf.mxu2  ;;  %v597_v25 = vpop.f32.mrf.mxu3 }
 0x1d9   :  { %v549_v26 = vadd.f32 %v548_v27, %v429_v9  ;;  %v598_v28 = vadd.f32 %v597_v25, %v429_v9 }
 0x1db   :  { %v634_v13 = vmax.f32 %v549_v26, 0.0  ;;  %v635_v15 = vmax.f32 %v598_v28, 0.0 }
 0x1e0   :  { %v550_v1 = vpop.f32.mrf.mxu2  ;;  %v599_v7 = vpop.f32.mrf.mxu3 }
 0x1e1   :  { %v551_v12 = vadd.f32 %v550_v1, %v434_v55  ;;  %v600_v60 = vadd.f32 %v599_v7, %v434_v55 }
 0x1e3   :  { %v636_v16 = vmax.f32 %v551_v12, 0.0  ;;  %v637_v11 = vmax.f32 %v600_v60, 0.0 }
 0x1e5   :  { %v1145_v17 = vpack.c.bf16 %v636_v16, %v634_v13  ;;  %v1147_v18 = vpack.c.bf16 %v637_v11, %v635_v15 }
 0x1e8   :  { %v553_v19 = vpop.f32.mrf.mxu2  ;;  %v602_v20 = vpop.f32.mrf.mxu3 }
 0x1e9   :  { %v554_v28 = vadd.f32 %v553_v19, %v1122_v6  ;;  %v603_v1 = vadd.f32 %v602_v20, %v1122_v6  ;;  %v654_v6 = vld [vmem:[%s1184_s5] sm:$0x1] }
 0x1eb   :  { %v638_v16 = vmax.f32 %v554_v28, 0.0  ;;  %v639_v11 = vmax.f32 %v603_v1, 0.0 }
 0x1f0   :  { %v555_v21 = vpop.f32.mrf.mxu2  ;;  %v604_v22 = vpop.f32.mrf.mxu3 }
 0x1f1   :  { %v605_v5 = vadd.f32 %v604_v22, %v1131_v14 }
 0x1f3   :  { %v641_v60 = vmax.f32 %v605_v5, 0.0 }
 0x1f8   :  { %v558_v23 = vpop.f32.mrf.mxu2  ;;  %v607_v24 = vpop.f32.mrf.mxu3 }
 0x1f9   :  { %v559_v0 = vadd.f32 %v558_v23, %v1129_v10 }
 0x1fb   :  { %v642_v7 = vmax.f32 %v559_v0, 0.0 }
 0x200   :  { %v560_v29 = vpop.f32.mrf.mxu2  ;;  %v609_v9 = vpop.f32.mrf.mxu3 }
 0x201   :  { %v610_v46 = vadd.f32 %v609_v9, %v1120_v4 }
 0x203   :  { %v645_v25 = vmax.f32 %v610_v46, 0.0 }
 0x208   :  { %v563_v30 = vpop.f32.mrf.mxu2  ;;  %v612_v31 = vpop.f32.mrf.mxu3 }
 0x209   :  { %v564_v43 = vadd.f32 %v563_v30, %v1116_v2  ;;  %v613_v44 = vadd.f32 %v612_v31, %v1116_v2  ;;  %v556_v2 = vadd.f32 %v555_v21, %v1131_v14  ;;  %v664_v21 = vpack.c.bf16 %v641_v60, %v639_v11 }
 0x20b   :  { %v646_v61 = vmax.f32 %v564_v43, 0.0  ;;  %v647_v59 = vmax.f32 %v613_v44, 0.0 }
 0x210   :  { %v565_v33 = vpop.f32.mrf.mxu2  ;;  %v614_v55 = vpop.f32.mrf.mxu3 }
 0x211   :  { %v566_v38 = vadd.f32 %v565_v33, %v1118_v3  ;;  %v615_v39 = vadd.f32 %v614_v55, %v1118_v3 }
 0x213   :  { %v648_v58 = vmax.f32 %v566_v38, 0.0  ;;  %v649_v62 = vmax.f32 %v615_v39, 0.0 }
 0x215   :  { %v667_v26 = vpack.c.bf16 %v648_v58, %v646_v61 }
 0x218   :  { %v568_v34 = vpop.f32.mrf.mxu2  ;;  %v617_v35 = vpop.f32.mrf.mxu3 }
 0x219   :  { %v569_v36 = vadd.f32 %v568_v34, %v1111_v42  ;;  %v618_v53 = vadd.f32 %v617_v35, %v1111_v42  ;;  %v561_v42 = vadd.f32 %v560_v29, %v1120_v4  ;;  %v668_v4 = vpack.c.bf16 %v649_v62, %v647_v59 }
 0x21b   :  { %v650_v48 = vmax.f32 %v569_v36, 0.0  ;;  %v651_v50 = vmax.f32 %v618_v53, 0.0  ;;  %v644_v27 = vmax.f32 %v561_v42, 0.0 }
 0x21d   :  { %v665_v13 = vpack.c.bf16 %v644_v27, %v642_v7 }
 0x220   :  { %v570_v37 = vpop.f32.mrf.mxu2  ;;  %v619_v52 = vpop.f32.mrf.mxu3 }
 0x221   :  { %v571_v49 = vadd.f32 %v570_v37, %v1127_v8  ;;  %v620_v40 = vadd.f32 %v619_v52, %v1127_v8  ;;  %v608_v8 = vadd.f32 %v607_v24, %v1129_v10  ;;  %v640_v10 = vmax.f32 %v556_v2, 0.0 }
 0x223   :  { %v652_v54 = vmax.f32 %v571_v49, 0.0  ;;  %v653_v57 = vmax.f32 %v620_v40, 0.0  ;;  %v643_v12 = vmax.f32 %v608_v8, 0.0  ;;  %v663_v14 = vpack.c.bf16 %v640_v10, %v638_v16 }
 0x225   :  { %v669_v63 = vpack.c.bf16 %v652_v54, %v650_v48  ;;  %v670_v3 = vpack.c.bf16 %v653_v57, %v651_v50  ;;  %v666_v15 = vpack.c.bf16 %v645_v25, %v643_v12 }
 0x227   :  { %677 = vmatpush.bf16.msrb.mxu0 %v669_v63  ;;  %690 = vmatpush.bf16.msrb.mxu1 %v670_v3 }
 0x22b   :  { %678 = vmatpush.bf16.msrb.mxu0 %v667_v26  ;;  %691 = vmatpush.bf16.msrb.mxu1 %v668_v4 }
 0x22f   :  { %679 = vmatpush.bf16.msrb.mxu0 %v665_v13  ;;  %692 = vmatpush.bf16.msrb.mxu1 %v666_v15 }
 0x233   :  { %680 = vmatpush.bf16.msrb.mxu0 %v663_v14  ;;  %693 = vmatpush.bf16.msrb.mxu1 %v664_v21 }
 0x237   :  { %681 = vmatpush.bf16.msrb.mxu0 %v1145_v17  ;;  %694 = vmatpush.bf16.msrb.mxu1 %v1147_v18  ;;  %v675_v17 = vpop.permute.xlu2 %674 }
 0x23b   :  { %682 = vmatpush.bf16.msrb.mxu0 %v1141_v56  ;;  %695 = vmatpush.bf16.msrb.mxu1 %v1143_v41 }
 0x23f   :  { %683 = vmatpush.bf16.msrb.mxu0 %v1137_v45  ;;  %696 = vmatpush.bf16.msrb.mxu1 %v1139_v51 }
 0x243   :  { %684 = vmatpush.bf16.msrb.mxu0 %v1133_v32  ;;  %697 = vmatpush.bf16.msrb.mxu1 %v1135_v47 }
 0x246   :  { %685 = vmatmul.bf16.vlgmr.msrb.gmra.mxu0 %v654_v6  ;;  %698 = vmatmul.bf16.vlgmr.msrb.gmra.mxu1 %v654_v6 }
 0x2c3   :  { %v686_v18 = vpop.f32.mrf.mxu0  ;;  %v699_v19 = vpop.f32.mrf.mxu1 }
 0x2c4   :  { %v700_v56 = vadd.f32 %v699_v19, %v675_v17  ;;  %v687_v32 = vadd.f32 %v686_v18, %v675_v17 }
 0x2c6   :  { %v705_v45 = vrot.slane %v700_v56, 6 }
 0x2c8   :  { %v707_v47 = vsel %vm706_vm2, %v687_v32, %v705_v45 }
 0x2c9   :  { %709 = vst [vmem:[#allocation2] sm:$0xf] %v707_v47 }
 0x2ca   :  { %720 = dma.vmem_to_hbm [thread:$0]  %s716_s24, 64, %s718_s27, [#allocation3]  }
 0x2cb   :  { %v688_v51 = vpop.f32.mrf.mxu0  ;;  %v701_v41 = vpop.f32.mrf.mxu1 }
 0x2cc   :  { %851 = dma.done.wait [#allocation3], 64  }
 0x2cd   :  { %852 = vsyncadd [#allocation3], 4294967232 }
 0x2ce   :  { %725 = vsyncpa [#allocation3], 1 }

</bundles_post_ra>
